<compile_context>
chip_gen: v7x
topology: tpu7x:2x2x1
jax: 0.10.0
libtpu: 0.0.40
codegen_flags: <defaults>
</compile_context>

<pallas_src>
import functools

import numpy as np
import jax
import jax.numpy as jnp
from jax import lax
from jax.experimental import pallas as pl
from jax.experimental.pallas import tpu as pltpu

FEATURE_DIM = 64
INPUT_DIM = 4


def _round_up(x, m):
    return ((x + m - 1) // m) * m


def _ceil_div(a, b):
    return -(-a // b)


# ----------------------------------------------------------------------------
# Kernel 1: edge coefficients l*c(.) for guide_feats = cat([guide, img], 1)
# ----------------------------------------------------------------------------
def _coef_kernel(guide_ref, img_ref, vmask_ref, hmask_ref, cvl_ref, chl_ref, *, K, l):
    Cg, Hp, PWp = guide_ref.shape

    def nxt_r(a):  # a[i+1, j] -> position (i, j)   (== np.roll(a, -1, 0))
        return pltpu.roll(a, Hp - 1, 0)

    def nxt_c(a):  # a[i, j+1] -> position (i, j)   (== np.roll(a, -1, 1))
        return pltpu.roll(a, PWp - 1, 1)

    I0 = img_ref[...]
    sum_v = jnp.abs(nxt_r(I0) - I0)
    sum_h = jnp.abs(nxt_c(I0) - I0)
    for ci in range(Cg):                       # static channel loop
        Gc = guide_ref[ci]
        sum_v = sum_v + jnp.abs(nxt_r(Gc) - Gc)
        sum_h = sum_h + jnp.abs(nxt_c(Gc) - Gc)

    inv_n = 1.0 / float(Cg + 1)
    inv_k2 = 1.0 / float(K * K)
    mv = sum_v * inv_n
    mh = sum_h * inv_n
    # vmask/hmask are 1 on valid edges and 0 on the last row / within-batch last
    # column / lane padding.  l is folded in here so the hot diffusion loop does
    # no per-step scaling or masking at all.
    cvl_ref[...] = (l * vmask_ref[...]) / (1.0 + (mv * mv) * inv_k2)
    chl_ref[...] = (l * hmask_ref[...]) / (1.0 + (mh * mh) * inv_k2)


# ----------------------------------------------------------------------------
# Kernel 2: Npre-step anisotropic diffusion (diffuse_step + adjust_step)
# ----------------------------------------------------------------------------
def _diffuse_kernel(img_ref, cvl_ref, chl_ref, src_ref, minv_ref,
                    dv_ref, dht_ref, uv_ref, uht_ref, out_ref,
                    *, n_steps, eps, unroll):
    Hp, PWp = img_ref.shape

    def body(_, I):
        # ---- diffuse_step: full-tile rolls (XLU) instead of slice+concat.
        #      cvl/chl already contain l and the edge/pad zeros, read straight
        #      from VMEM each iteration (no long-lived hoisted copies). ----
        tv = cvl_ref[...] * (pltpu.roll(I, Hp - 1, 0) - I)
        th = chl_ref[...] * (pltpu.roll(I, PWp - 1, 1) - I)
        I = I + tv - pltpu.roll(tv, 1, 0) + th - pltpu.roll(th, 1, 1)
        # ---- adjust_step: adaptive-avg-pool / nearest-upsample as small MXU
        #      matmuls.  Row-pool FIRST (Dv @ I) so the large contraction has
        #      free dim sh instead of Ssw. ----
        img_ss = jnp.dot(
            jnp.dot(dv_ref[...], I, preferred_element_type=jnp.float32),
            dht_ref[...], preferred_element_type=jnp.float32)
        ratio_ss = src_ref[...] * pl.reciprocal(img_ss + eps, approx=False)
        ratio_ss = jnp.where(minv_ref[...] > 0.5, 1.0, ratio_ss)
        ratio = jnp.dot(
            uv_ref[...],
            jnp.dot(ratio_ss, uht_ref[...], preferred_element_type=jnp.float32),
            preferred_element_type=jnp.float32)
        return I * ratio

    out_ref[...] = lax.fori_loop(0, n_steps, body, img_ref[...], unroll=unroll)


# ----------------------------------------------------------------------------
# Host-side packing / operator construction
# ----------------------------------------------------------------------------
def _pack_batch(x, gpack):
    """(B, C, H, W) -> (ceil(B/gpack), C, H, gpack*W); batch zero-padded if needed."""
    B, C, H, W = x.shape
    G = _ceil_div(B, gpack)
    Bp = G * gpack
    if Bp != B:
        x = jnp.pad(x, ((0, Bp - B), (0, 0), (0, 0), (0, 0)))
    return x.reshape(G, gpack, C, H, W).transpose(0, 2, 3, 1, 4).reshape(G, C, H, gpack * W)


def _unpack_batch(y, B, gpack, H, W):
    """(G, Hp, PWp) -> (B, 1, H, W) (crops padding, unpacks lanes, drops pad batches)."""
    G = y.shape[0]
    y = y[:, :H, :gpack * W].reshape(G, H, gpack, W).transpose(0, 2, 1, 3)
    return y.reshape(G * gpack, H, W)[:B, None]


def _pad_last2(x, hp, wp):
    pads = [(0, 0)] * (x.ndim - 2) + [(0, hp - x.shape[-2]), (0, wp - x.shape[-1])]
    return jnp.pad(x, pads)


def _packed_operators(H, W, sh, sw, gpack, Hp, PWp):
    """Block-diagonal avg-pool / nearest-upsample matrices + edge masks (numpy)."""
    fh, fw = H // sh, W // sw
    PW, Ssw = gpack * W, gpack * sw

    r = np.arange(Hp)
    rv = r < H
    s = np.arange(sh)
    Dv = np.where((r[None, :] // fh == s[:, None]) & rv[None, :], 1.0 / fh, 0.0)   # (sh, Hp)
    Uv = np.where((r[:, None] // fh == s[None, :]) & rv[:, None], 1.0, 0.0)        # (Hp, sh)

    j = np.arange(PWp)
    jb, jw, jv = j // W, j % W, j < PW
    t = np.arange(Ssw)
    tb, tw = t // sw, t % sw
    DhT = np.where(jv[:, None] & (jb[:, None] == tb[None, :])
                   & (jw[:, None] // fw == tw[None, :]), 1.0 / fw, 0.0)            # (PWp, Ssw)
    UhT = np.where(jv[None, :] & (tb[:, None] == jb[None, :])
                   & (tw[:, None] == jw[None, :] // fw), 1.0, 0.0)                 # (Ssw, PWp)

    vmask = ((r < H - 1)[:, None] & jv[None, :]).astype(np.float32)                # (Hp, PWp)
    hmask = (rv[:, None] & (jv & (jw != W - 1))[None, :]).astype(np.float32)       # (Hp, PWp)

    f32 = lambda a: jnp.asarray(a, jnp.float32)
    return f32(Dv), f32(DhT), f32(Uv), f32(UhT), f32(vmask), f32(hmask)


def _choose_gpack(B, W):
    """Lane-packing factor from a tiny cost model.

    work_1core = ceil(B/gp) * round_up(gp*W,128)   ~ wall clock on v5e/v6e (1 TC)
    work_2core = ceil(ceil(B/gp)/2) * round_up(...) ~ wall clock on v7x (2 TCs,
                                                      'parallel' grid axis)
    Minimize (work_1core, work_2core, gp): never regress single-TC chips, and
    when it is free (equal padded per-plane work) keep G >= 2 so v7x's two
    TensorCores are both fed.  Batch is padded to a multiple of gp, so gp need
    not divide B (padded planes are isolated by the masked coefficients and
    stay exactly zero).
    """
    max_pack = min(B, max(1, 512 // max(W, 1)))
    best_key, best_gp = None, 1
    for gp in range(1, max_pack + 1):
        G = _ceil_div(B, gp)
        PWp = _round_up(gp * W, 128)
        key = (G * PWp, _ceil_div(G, 2) * PWp, gp)
        if best_key is None or key < best_key:
            best_key, best_gp = key, gp
    return best_gp


def _physical_vmem_bytes():
    try:
        return int(pltpu.get_tpu_info().vmem_capacity_bytes)
    except Exception:
        pass
    try:
        kind = jax.devices()[0].device_kind.lower()
        if "v7" in kind:
            return 64 << 20
        return 128 << 20
    except Exception:
        return 64 << 20          # v7x-safe conservative fallback


def _vmem_limit_bytes(entries):
    """entries: list of (shape, n_buffers). Leaves headroom below physical VMEM."""
    need = sum(int(np.prod(s)) * 4 * int(n) for s, n in entries) + (2 << 20)
    cap = (_physical_vmem_bytes() * 7) // 8      # never request full physical VMEM
    return int(min(max(need, 32 << 20), cap))


def _adaptive_unroll(Hp, PWp, n_steps):
    """Deep unroll for vreg-sized planes (loop/MXU-latency bound), shallow for big."""
    vregs = max(1, (Hp // 8) * (max(PWp, 128) // 128))
    if vregs <= 8:
        u = 8
    elif vregs <= 32:
        u = 4
    elif vregs <= 128:
        u = 2
    else:
        u = 1
    return max(1, min(u, max(int(n_steps), 1)))


# ----------------------------------------------------------------------------
# Wrapper: pallas_call plumbing
# ----------------------------------------------------------------------------
def _diffuse_pallas_impl(img, guide, source, mask_inv_f, *, n_steps, K, l, eps,
                         unroll, single_buffer_invariants):
    B, _, H, W = img.shape
    Cg = guide.shape[1]
    sh, sw = source.shape[2], source.shape[3]
    assert H % sh == 0 and W % sw == 0, "exact-factor pooling assumed"

    gpack = _choose_gpack(B, W)
    G = _ceil_div(B, gpack)
    Hp = _round_up(H, 8)
    PWp = _round_up(gpack * W, 128)
    Ssw = gpack * sw

    guide_p = _pad_last2(_pack_batch(guide, gpack), Hp, PWp)            # (G,Cg,Hp,PWp)
    img_p = _pad_last2(_pack_batch(img, gpack), Hp, PWp)[:, 0]          # (G,Hp,PWp)
    src_p = _pack_batch(source, gpack)[:, 0]                            # (G,sh,Ssw)
    minv_p = _pack_batch(mask_inv_f, gpack)[:, 0]                       # (G,sh,Ssw)
    Dv, DhT, Uv, UhT, vmask, hmask = _packed_operators(H, W, sh, sw, gpack, Hp, PWp)

    if unroll is None:
        unroll = _adaptive_unroll(Hp, PWp, n_steps)
    unroll = max(1, min(int(unroll), max(int(n_steps), 1)))

    def spec(block_shape, index_map, invariant=False):
        if invariant and single_buffer_invariants:
            # Each grid step runs n_steps (~8000) inner iterations, so there is
            # nothing to overlap: single-buffer the loop-invariant inputs.
            return pl.BlockSpec(block_shape, index_map, pipeline_mode=pl.Buffered(1))
        return pl.BlockSpec(block_shape, index_map)

    plane = lambda inv=False: spec((pl.Squeezed(), Hp, PWp), lambda g: (g, 0, 0), inv)
    small = lambda inv=False: spec((pl.Squeezed(), sh, Ssw), lambda g: (g, 0, 0), inv)
    shared = lambda a, b, inv=False: spec((a, b), lambda g: (0, 0), inv)

    # ---- kernel 1: one-shot edge coefficients (keeps the Cg-channel guide out
    #      of the long-running diffusion kernel => lower VMEM pressure) ----
    coef_entries = ([((Cg, Hp, PWp), 2)] + [((Hp, PWp), 2)] * 5 + [((Hp, PWp), 3)])
    cvl_full, chl_full = pl.pallas_call(
        functools.partial(_coef_kernel, K=float(K), l=float(l)),
        out_shape=(jax.ShapeDtypeStruct((G, Hp, PWp), jnp.float32),
                   jax.ShapeDtypeStruct((G, Hp, PWp), jnp.float32)),
        grid_spec=pltpu.PrefetchScalarGridSpec(
            num_scalar_prefetch=0,
            grid=(G,),
            in_specs=[
                pl.BlockSpec((pl.Squeezed(), Cg, Hp, PWp), lambda g: (g, 0, 0, 0)),
                pl.BlockSpec((pl.Squeezed(), Hp, PWp), lambda g: (g, 0, 0)),
                pl.BlockSpec((Hp, PWp), lambda g: (0, 0)),
                pl.BlockSpec((Hp, PWp), lambda g: (0, 0)),
            ],
            out_specs=[pl.BlockSpec((pl.Squeezed(), Hp, PWp), lambda g: (g, 0, 0)),
                       pl.BlockSpec((pl.Squeezed(), Hp, PWp), lambda g: (g, 0, 0))],
        ),
        compiler_params=pltpu.CompilerParams(
            dimension_semantics=("parallel",),
            vmem_limit_bytes=_vmem_limit_bytes(coef_entries)),
    )(guide_p, img_p, vmask, hmask)

    # ---- kernel 2: n_steps-step diffusion loop ----
    nbuf = 1 if single_buffer_invariants else 2
    diff_entries = [((Hp, PWp), 2), ((Hp, PWp), 2),                    # img in / out
                    ((Hp, PWp), nbuf), ((Hp, PWp), nbuf),              # cvl, chl
                    ((sh, Ssw), nbuf), ((sh, Ssw), nbuf),              # src, mask
                    ((sh, Hp), nbuf), ((PWp, Ssw), nbuf),
                    ((Hp, sh), nbuf), ((Ssw, PWp), nbuf),
                    ((Hp, PWp), 4)]                                    # loop working set
    per_step_flops = (14 * Hp * PWp
                      + 2 * sh * PWp * (2 * Hp + 2 * Ssw)
                      + 4 * sh * Ssw)
    cost = pl.CostEstimate(
        flops=int(n_steps) * G * int(per_step_flops),
        transcendentals=int(n_steps) * G * sh * Ssw,
        bytes_accessed=int(4 * (G * (4 * Hp * PWp + 2 * sh * Ssw)
                                + sh * Hp + PWp * Ssw + Hp * sh + Ssw * PWp)))

    y_p = pl.pallas_call(
        functools.partial(_diffuse_kernel, n_steps=int(n_steps), eps=float(eps),
                          unroll=unroll),
        out_shape=jax.ShapeDtypeStruct((G, Hp, PWp), jnp.float32),
        grid_spec=pltpu.PrefetchScalarGridSpec(
            num_scalar_prefetch=0,
            grid=(G,),
            in_specs=[
                plane(False),                      # evolving image (initial state)
                plane(True), plane(True),          # l*cv, l*ch
                small(True), small(True),          # source, mask_inv
                shared(sh, Hp, True), shared(PWp, Ssw, True),
                shared(Hp, sh, True), shared(Ssw, PWp, True),
            ],
            out_specs=plane(False),
        ),
        compiler_params=pltpu.CompilerParams(
            dimension_semantics=("parallel",),
            vmem_limit_bytes=_vmem_limit_bytes(diff_entries)),
        cost_estimate=cost,
    )(img_p, cvl_full, chl_full, src_p, minv_p, Dv, DhT, Uv, UhT)

    # Surface any runtime failure inside the caller's try/except fallback.
    jax.block_until_ready(y_p)

    l32 = np.float32(l)
    y = _unpack_batch(y_p, B, gpack, H, W)
    cv = _unpack_batch(cvl_full / l32, B, gpack, H, W)[:, :, :H - 1, :]
    ch = _unpack_batch(chl_full / l32, B, gpack, H, W)[:, :, :, :W - 1]
    return y, {'cv': cv, 'ch': ch}


def diffuse_pallas(img, guide, source, mask_inv_f, *, n_steps, K=0.03, l=0.24,
                   eps=1e-8, unroll=None):
    kwargs = dict(n_steps=n_steps, K=K, l=l, eps=eps, unroll=unroll)
    try:
        return _diffuse_pallas_impl(img, guide, source, mask_inv_f,
                                    single_buffer_invariants=True, **kwargs)
    except Exception:
        # TODO(synk): pl.Buffered(1) single-buffering rejected by this jax
        # version; fall back to default double-buffered invariant inputs.
        return _diffuse_pallas_impl(img, guide, source, mask_inv_f,
                                    single_buffer_invariants=False, **kwargs)


# ----------------------------------------------------------------------------
# GADBase (forward pass only, feature_extractor='none')
# ----------------------------------------------------------------------------
class GADBase:
    def __init__(self, feature_extractor='none', Npre=8000, Ntrain=1024,
                 use_transformer=True, transformer_blocks=2, transformer_heads=8):
        if feature_extractor != 'none':
            # TODO(synk): 'UNet' path (resnet50 UNet + transformer) not translated.
            raise NotImplementedError(f'Feature extractor {feature_extractor}')
        self.feature_extractor = None
        self.Npre = Npre
        self.Ntrain = 0                      # matches PyTorch: 'none' forces Ntrain = 0
        self.logk = jnp.log(jnp.asarray(0.03, jnp.float32))

    def forward(self, sample, train=False, deps=0.1):
        guide = sample['guide'].astype(jnp.float32)
        source = sample['source'].astype(jnp.float32)
        mask_lr = sample['mask_lr'].astype(jnp.float32)
        y_bic = sample['y_bicubic'].astype(jnp.float32)

        shifted = source.min() <= deps
        source = jnp.where(shifted, source + deps, source)
        y_bic = jnp.where(shifted, y_bic + deps, y_bic)

        K = float(jnp.exp(self.logk))        # inference-only; K baked as a constant
        # train=False -> Npre iterations (no randrange), then Ntrain (=0 here).
        n_steps = self.Npre + self.Ntrain
        mask_inv_f = (mask_lr < 0.5).astype(jnp.float32)

        y_pred, aux = diffuse_pallas(y_bic, guide, source, mask_inv_f,
                                     n_steps=n_steps, K=K, l=0.24, eps=1e-8)
        y_pred = jnp.where(shifted, y_pred - deps, y_pred)
        return {'y_pred': y_pred, **aux}


# ----------------------------------------------------------------------------
# Pure-JAX reference (mirrors the PyTorch math) for validation
# ----------------------------------------------------------------------------
def _reference(guide, img, source, mask_inv_f, n_steps, K=0.03, l=0.24, eps=1e-8):
    B, _, H, W = img.shape
    sh, sw = source.shape[2], source.shape[3]
    fh, fw = H // sh, W // sw
    feats = jnp.concatenate([guide, img], axis=1)
    mean_v = jnp.mean(jnp.abs(feats[:, :, 1:, :] - feats[:, :, :-1, :]), axis=1, keepdims=True)
    mean_h = jnp.mean(jnp.abs(feats[:, :, :, 1:] - feats[:, :, :, :-1]), axis=1, keepdims=True)
    cv = 1.0 / (1.0 + jnp.abs(mean_v * mean_v) / (K * K))
    ch = 1.0 / (1.0 + jnp.abs(mean_h * mean_h) / (K * K))
    padr = jnp.zeros((B, 1, 1, W), jnp.float32)
    padc = jnp.zeros((B, 1, H, 1), jnp.float32)

    def body(_, I):
        dv = I[:, :, 1:, :] - I[:, :, :-1, :]
        dh = I[:, :, :, 1:] - I[:, :, :, :-1]
        tv = l * cv * dv
        th = l * ch * dh
        I = I - jnp.concatenate([padr, tv], axis=2) + jnp.concatenate([tv, padr], axis=2)
        I = I - jnp.concatenate([padc, th], axis=3) + jnp.concatenate([th, padc], axis=3)
        img_ss = I.reshape(B, 1, sh, fh, sw, fw).mean(axis=(3, 5))     # AdaptiveAvgPool2d
        ratio_ss = source / (img_ss + eps)
        ratio_ss = jnp.where(mask_inv_f > 0.5, 1.0, ratio_ss)
        ratio = jnp.repeat(jnp.repeat(ratio_ss, fh, axis=2), fw, axis=3)  # nearest upsample
        return I * ratio

    I = lax.fori_loop(0, n_steps, body, img)
    return I, cv, ch


# ----------------------------------------------------------------------------
if __name__ == "__main__":
    key = jax.random.PRNGKey(0)
    B, Cg, H, W = 2, 3, 16, 16     # guide: RGB; INPUT_DIM = 3 guide + 1 depth = 4
    sh, sw = 8, 8                  # low-res source grid
    kg, kd, km, kn = jax.random.split(key, 4)

    guide = jax.random.uniform(kg, (B, Cg, H, W), jnp.float32)
    depth_hr = 1.0 + 4.0 * jax.random.uniform(kd, (B, 1, H, W), jnp.float32)  # positive depths
    source = depth_hr.reshape(B, 1, sh, H // sh, sw, W // sw).mean(axis=(3, 5))
    mask_lr = (jax.random.uniform(km, (B, 1, sh, sw)) > 0.2).astype(jnp.float32)
    y_bicubic = depth_hr + 0.05 * jax.random.normal(kn, (B, 1, H, W), jnp.float32)

    # Npre=64 for a small, fast demo (module default is 8000 identical iterations).
    model = GADBase(feature_extractor='none', Npre=64)
    sample = {'guide': guide, 'source': source, 'mask_lr': mask_lr, 'y_bicubic': y_bicubic}

    out = model.forward(sample, train=False)
    y_pred = jax.block_until_ready(out['y_pred'])

    # Validate against the pure-JAX reference.
    mask_inv_f = (mask_lr < 0.5).astype(jnp.float32)
    y_ref, cv_ref, ch_ref = _reference(guide, y_bicubic, source, mask_inv_f,
                                       n_steps=model.Npre + model.Ntrain, K=0.03)
    assert y_pred.shape == (B, 1, H, W)
    assert out['cv'].shape == (B, 1, H - 1, W) and out['ch'].shape == (B, 1, H, W - 1)
    assert bool(jnp.all(jnp.isfinite(y_pred)))
    assert jnp.allclose(y_pred, y_ref, atol=1e-3, rtol=1e-3)
    assert jnp.allclose(out['cv'], cv_ref, atol=1e-4, rtol=1e-4)
    assert jnp.allclose(out['ch'], ch_ref, atol=1e-4, rtol=1e-4)

    print("KERNEL_OK")
</pallas_src>

<mosaic_0001>
module attributes {stable_mosaic.version = 11 : i64} {
  func.func @_coef_kernel(%arg0: i32, %arg1: memref<1x3x16x128xf32, #tpu.memory_space<vmem>>, %arg2: memref<1x16x128xf32, #tpu.memory_space<vmem>>, %arg3: memref<16x128xf32, #tpu.memory_space<vmem>>, %arg4: memref<16x128xf32, #tpu.memory_space<vmem>>, %arg5: memref<1x16x128xf32, #tpu.memory_space<vmem>>, %arg6: memref<1x16x128xf32, #tpu.memory_space<vmem>>) attributes {dimension_semantics = [#tpu.dimension_semantics<parallel>], iteration_bounds = array<i64: 1>, scalar_prefetch = 0 : i64, scratch_operands = 0 : i64, tpu.core_type = #tpu.core_type<tc>, window_params = [{transform_indices = @transform_0, window_bounds = array<i64: 1, 3, 16, 128>}, {transform_indices = @transform_1, window_bounds = array<i64: 1, 16, 128>}, {pipeline_mode = #tpu.pipeline_mode<synchronous>, transform_indices = @transform_2, window_bounds = array<i64: 16, 128>}, {pipeline_mode = #tpu.pipeline_mode<synchronous>, transform_indices = @transform_3, window_bounds = array<i64: 16, 128>}, {transform_indices = @transform_4, window_bounds = array<i64: 1, 16, 128>}, {transform_indices = @transform_5, window_bounds = array<i64: 1, 16, 128>}]} {
    %c0 = arith.constant 0 : index
    %c0_0 = arith.constant 0 : index
    %c0_1 = arith.constant 0 : index
    %0 = vector.load %arg2[%c0, %c0_0, %c0_1] : memref<1x16x128xf32, #tpu.memory_space<vmem>>, vector<1x16x128xf32>
    %1 = vector.shape_cast %0 : vector<1x16x128xf32> to vector<16x128xf32>
    %c15_i32 = arith.constant 15 : i32
    %2 = tpu.dynamic_rotate %1 by %c15_i32 dim 0 : vector<16x128xf32>, i32 -> vector<16x128xf32>
    %3 = arith.subf %2, %1 : vector<16x128xf32>
    %4 = math.absf %3 : vector<16x128xf32>
    %c127_i32 = arith.constant 127 : i32
    %5 = tpu.dynamic_rotate %1 by %c127_i32 dim 1 : vector<16x128xf32>, i32 -> vector<16x128xf32>
    %6 = arith.subf %5, %1 : vector<16x128xf32>
    %7 = math.absf %6 : vector<16x128xf32>
    %c0_2 = arith.constant 0 : index
    %c0_3 = arith.constant 0 : index
    %c0_4 = arith.constant 0 : index
    %c0_5 = arith.constant 0 : index
    %8 = vector.load %arg1[%c0_2, %c0_3, %c0_4, %c0_5] : memref<1x3x16x128xf32, #tpu.memory_space<vmem>>, vector<1x1x16x128xf32>
    %9 = vector.shape_cast %8 : vector<1x1x16x128xf32> to vector<16x128xf32>
    %c15_i32_6 = arith.constant 15 : i32
    %10 = tpu.dynamic_rotate %9 by %c15_i32_6 dim 0 : vector<16x128xf32>, i32 -> vector<16x128xf32>
    %11 = arith.subf %10, %9 : vector<16x128xf32>
    %12 = math.absf %11 : vector<16x128xf32>
    %13 = arith.addf %4, %12 : vector<16x128xf32>
    %c127_i32_7 = arith.constant 127 : i32
    %14 = tpu.dynamic_rotate %9 by %c127_i32_7 dim 1 : vector<16x128xf32>, i32 -> vector<16x128xf32>
    %15 = arith.subf %14, %9 : vector<16x128xf32>
    %16 = math.absf %15 : vector<16x128xf32>
    %17 = arith.addf %7, %16 : vector<16x128xf32>
    %c0_8 = arith.constant 0 : index
    %c1 = arith.constant 1 : index
    %c0_9 = arith.constant 0 : index
    %c0_10 = arith.constant 0 : index
    %18 = vector.load %arg1[%c0_8, %c1, %c0_9, %c0_10] : memref<1x3x16x128xf32, #tpu.memory_space<vmem>>, vector<1x1x16x128xf32>
    %19 = vector.shape_cast %18 : vector<1x1x16x128xf32> to vector<16x128xf32>
    %c15_i32_11 = arith.constant 15 : i32
    %20 = tpu.dynamic_rotate %19 by %c15_i32_11 dim 0 : vector<16x128xf32>, i32 -> vector<16x128xf32>
    %21 = arith.subf %20, %19 : vector<16x128xf32>
    %22 = math.absf %21 : vector<16x128xf32>
    %23 = arith.addf %13, %22 : vector<16x128xf32>
    %c127_i32_12 = arith.constant 127 : i32
    %24 = tpu.dynamic_rotate %19 by %c127_i32_12 dim 1 : vector<16x128xf32>, i32 -> vector<16x128xf32>
    %25 = arith.subf %24, %19 : vector<16x128xf32>
    %26 = math.absf %25 : vector<16x128xf32>
    %27 = arith.addf %17, %26 : vector<16x128xf32>
    %c0_13 = arith.constant 0 : index
    %c2 = arith.constant 2 : index
    %c0_14 = arith.constant 0 : index
    %c0_15 = arith.constant 0 : index
    %28 = vector.load %arg1[%c0_13, %c2, %c0_14, %c0_15] : memref<1x3x16x128xf32, #tpu.memory_space<vmem>>, vector<1x1x16x128xf32>
    %29 = vector.shape_cast %28 : vector<1x1x16x128xf32> to vector<16x128xf32>
    %c15_i32_16 = arith.constant 15 : i32
    %30 = tpu.dynamic_rotate %29 by %c15_i32_16 dim 0 : vector<16x128xf32>, i32 -> vector<16x128xf32>
    %31 = arith.subf %30, %29 : vector<16x128xf32>
    %32 = math.absf %31 : vector<16x128xf32>
    %33 = arith.addf %23, %32 : vector<16x128xf32>
    %c127_i32_17 = arith.constant 127 : i32
    %34 = tpu.dynamic_rotate %29 by %c127_i32_17 dim 1 : vector<16x128xf32>, i32 -> vector<16x128xf32>
    %35 = arith.subf %34, %29 : vector<16x128xf32>
    %36 = math.absf %35 : vector<16x128xf32>
    %37 = arith.addf %27, %36 : vector<16x128xf32>
    %cst = arith.constant 2.500000e-01 : f32
    %38 = vector.broadcast %cst : f32 to vector<16x128xf32>
    %39 = arith.mulf %33, %38 : vector<16x128xf32>
    %cst_18 = arith.constant 2.500000e-01 : f32
    %40 = vector.broadcast %cst_18 : f32 to vector<16x128xf32>
    %41 = arith.mulf %37, %40 : vector<16x128xf32>
    %c0_19 = arith.constant 0 : index
    %c0_20 = arith.constant 0 : index
    %42 = vector.load %arg3[%c0_19, %c0_20] : memref<16x128xf32, #tpu.memory_space<vmem>>, vector<16x128xf32>
    %cst_21 = arith.constant 2.400000e-01 : f32
    %43 = vector.broadcast %cst_21 : f32 to vector<16x128xf32>
    %44 = arith.mulf %43, %42 : vector<16x128xf32>
    %45 = arith.mulf %39, %39 : vector<16x128xf32>
    %cst_22 = arith.constant 1111.11121 : f32
    %46 = vector.broadcast %cst_22 : f32 to vector<16x128xf32>
    %47 = arith.mulf %45, %46 : vector<16x128xf32>
    %cst_23 = arith.constant 1.000000e+00 : f32
    %48 = vector.broadcast %cst_23 : f32 to vector<16x128xf32>
    %49 = arith.addf %48, %47 : vector<16x128xf32>
    %50 = arith.divf %44, %49 : vector<16x128xf32>
    %c0_24 = arith.constant 0 : index
    %c0_25 = arith.constant 0 : index
    %c0_26 = arith.constant 0 : index
    %51 = vector.load %arg5[%c0_24, %c0_25, %c0_26] : memref<1x16x128xf32, #tpu.memory_space<vmem>>, vector<1x16x128xf32>
    %52 = vector.shape_cast %51 : vector<1x16x128xf32> to vector<16x128xf32>
    %53 = vector.shape_cast %50 : vector<16x128xf32> to vector<1x16x128xf32>
    tpu.vector_store %arg5[%c0_24, %c0_25, %c0_26], %53 {strides = array<i32>} : memref<1x16x128xf32, #tpu.memory_space<vmem>>, vector<1x16x128xf32>,
    %c0_27 = arith.constant 0 : index
    %c0_28 = arith.constant 0 : index
    %54 = vector.load %arg4[%c0_27, %c0_28] : memref<16x128xf32, #tpu.memory_space<vmem>>, vector<16x128xf32>
    %cst_29 = arith.constant 2.400000e-01 : f32
    %55 = vector.broadcast %cst_29 : f32 to vector<16x128xf32>
    %56 = arith.mulf %55, %54 : vector<16x128xf32>
    %57 = arith.mulf %41, %41 : vector<16x128xf32>
    %cst_30 = arith.constant 1111.11121 : f32
    %58 = vector.broadcast %cst_30 : f32 to vector<16x128xf32>
    %59 = arith.mulf %57, %58 : vector<16x128xf32>
    %cst_31 = arith.constant 1.000000e+00 : f32
    %60 = vector.broadcast %cst_31 : f32 to vector<16x128xf32>
    %61 = arith.addf %60, %59 : vector<16x128xf32>
    %62 = arith.divf %56, %61 : vector<16x128xf32>
    %c0_32 = arith.constant 0 : index
    %c0_33 = arith.constant 0 : index
    %c0_34 = arith.constant 0 : index
    %63 = vector.load %arg6[%c0_32, %c0_33, %c0_34] : memref<1x16x128xf32, #tpu.memory_space<vmem>>, vector<1x16x128xf32>
    %64 = vector.shape_cast %63 : vector<1x16x128xf32> to vector<16x128xf32>
    %65 = vector.shape_cast %62 : vector<16x128xf32> to vector<1x16x128xf32>
    tpu.vector_store %arg6[%c0_32, %c0_33, %c0_34], %65 {strides = array<i32>} : memref<1x16x128xf32, #tpu.memory_space<vmem>>, vector<1x16x128xf32>,
    return
  }
  func.func @transform_0(%arg0: i32) -> (i32, i32, i32, i32) {
    %c0_i32 = arith.constant 0 : i32
    %c0_i32_0 = arith.constant 0 : i32
    %c0_i32_1 = arith.constant 0 : i32
    %c0_i32_2 = arith.constant 0 : i32
    return %arg0, %c0_i32, %c0_i32_0, %c0_i32_1 : i32, i32, i32, i32
  }
  func.func @transform_1(%arg0: i32) -> (i32, i32, i32) {
    %c0_i32 = arith.constant 0 : i32
    %c0_i32_0 = arith.constant 0 : i32
    %c0_i32_1 = arith.constant 0 : i32
    return %arg0, %c0_i32, %c0_i32_0 : i32, i32, i32
  }
  func.func @transform_2(%arg0: i32) -> (i32, i32) {
    %c0_i32 = arith.constant 0 : i32
    %c0_i32_0 = arith.constant 0 : i32
    %c0_i32_1 = arith.constant 0 : i32
    return %c0_i32, %c0_i32_0 : i32, i32
  }
  func.func @transform_3(%arg0: i32) -> (i32, i32) {
    %c0_i32 = arith.constant 0 : i32
    %c0_i32_0 = arith.constant 0 : i32
    %c0_i32_1 = arith.constant 0 : i32
    return %c0_i32, %c0_i32_0 : i32, i32
  }
  func.func @transform_4(%arg0: i32) -> (i32, i32, i32) {
    %c0_i32 = arith.constant 0 : i32
    %c0_i32_0 = arith.constant 0 : i32
    %c0_i32_1 = arith.constant 0 : i32
    return %arg0, %c0_i32, %c0_i32_0 : i32, i32, i32
  }
  func.func @transform_5(%arg0: i32) -> (i32, i32, i32) {
    %c0_i32 = arith.constant 0 : i32
    %c0_i32_0 = arith.constant 0 : i32
    %c0_i32_1 = arith.constant 0 : i32
    return %arg0, %c0_i32, %c0_i32_0 : i32, i32, i32
  }
}

module attributes {stable_mosaic.version = 11 : i64} {
  func.func @_coef_kernel(%arg0: i32, %arg1: memref<1x3x16x128xf32, #tpu.memory_space<vmem>>, %arg2: memref<1x16x128xf32, #tpu.memory_space<vmem>>, %arg3: memref<16x128xf32, #tpu.memory_space<vmem>>, %arg4: memref<16x128xf32, #tpu.memory_space<vmem>>, %arg5: memref<1x16x128xf32, #tpu.memory_space<vmem>>, %arg6: memref<1x16x128xf32, #tpu.memory_space<vmem>>) attributes {dimension_semantics = [#tpu.dimension_semantics<parallel>], iteration_bounds = array<i64: 1>, scalar_prefetch = 0 : i64, scratch_operands = 0 : i64, tpu.core_type = #tpu.core_type<tc>, window_params = [{transform_indices = @transform_0, window_bounds = array<i64: 1, 3, 16, 128>}, {transform_indices = @transform_1, window_bounds = array<i64: 1, 16, 128>}, {pipeline_mode = #tpu.pipeline_mode<synchronous>, transform_indices = @transform_2, window_bounds = array<i64: 16, 128>}, {pipeline_mode = #tpu.pipeline_mode<synchronous>, transform_indices = @transform_3, window_bounds = array<i64: 16, 128>}, {transform_indices = @transform_4, window_bounds = array<i64: 1, 16, 128>}, {transform_indices = @transform_5, window_bounds = array<i64: 1, 16, 128>}]} {
    %c0 = arith.constant 0 : index
    %c0_0 = arith.constant 0 : index
    %c0_1 = arith.constant 0 : index
    %0 = vector.load %arg2[%c0, %c0_0, %c0_1] : memref<1x16x128xf32, #tpu.memory_space<vmem>>, vector<1x16x128xf32>
    %1 = vector.shape_cast %0 : vector<1x16x128xf32> to vector<16x128xf32>
    %c15_i32 = arith.constant 15 : i32
    %2 = tpu.dynamic_rotate %1 by %c15_i32 dim 0 : vector<16x128xf32>, i32 -> vector<16x128xf32>
    %3 = arith.subf %2, %1 : vector<16x128xf32>
    %4 = math.absf %3 : vector<16x128xf32>
    %c127_i32 = arith.constant 127 : i32
    %5 = tpu.dynamic_rotate %1 by %c127_i32 dim 1 : vector<16x128xf32>, i32 -> vector<16x128xf32>
    %6 = arith.subf %5, %1 : vector<16x128xf32>
    %7 = math.absf %6 : vector<16x128xf32>
    %c0_2 = arith.constant 0 : index
    %c0_3 = arith.constant 0 : index
    %c0_4 = arith.constant 0 : index
    %c0_5 = arith.constant 0 : index
    %8 = vector.load %arg1[%c0_2, %c0_3, %c0_4, %c0_5] : memref<1x3x16x128xf32, #tpu.memory_space<vmem>>, vector<1x1x16x128xf32>
    %9 = vector.shape_cast %8 : vector<1x1x16x128xf32> to vector<16x128xf32>
    %c15_i32_6 = arith.constant 15 : i32
    %10 = tpu.dynamic_rotate %9 by %c15_i32_6 dim 0 : vector<16x128xf32>, i32 -> vector<16x128xf32>
    %11 = arith.subf %10, %9 : vector<16x128xf32>
    %12 = math.absf %11 : vector<16x128xf32>
    %13 = arith.addf %4, %12 : vector<16x128xf32>
    %c127_i32_7 = arith.constant 127 : i32
    %14 = tpu.dynamic_rotate %9 by %c127_i32_7 dim 1 : vector<16x128xf32>, i32 -> vector<16x128xf32>
    %15 = arith.subf %14, %9 : vector<16x128xf32>
    %16 = math.absf %15 : vector<16x128xf32>
    %17 = arith.addf %7, %16 : vector<16x128xf32>
    %c0_8 = arith.constant 0 : index
    %c1 = arith.constant 1 : index
    %c0_9 = arith.constant 0 : index
    %c0_10 = arith.constant 0 : index
    %18 = vector.load %arg1[%c0_8, %c1, %c0_9, %c0_10] : memref<1x3x16x128xf32, #tpu.memory_space<vmem>>, vector<1x1x16x128xf32>
    %19 = vector.shape_cast %18 : vector<1x1x16x128xf32> to vector<16x128xf32>
    %c15_i32_11 = arith.constant 15 : i32
    %20 = tpu.dynamic_rotate %19 by %c15_i32_11 dim 0 : vector<16x128xf32>, i32 -> vector<16x128xf32>
    %21 = arith.subf %20, %19 : vector<16x128xf32>
    %22 = math.absf %21 : vector<16x128xf32>
    %23 = arith.addf %13, %22 : vector<16x128xf32>
    %c127_i32_12 = arith.constant 127 : i32
    %24 = tpu.dynamic_rotate %19 by %c127_i32_12 dim 1 : vector<16x128xf32>, i32 -> vector<16x128xf32>
    %25 = arith.subf %24, %19 : vector<16x128xf32>
    %26 = math.absf %25 : vector<16x128xf32>
    %27 = arith.addf %17, %26 : vector<16x128xf32>
    %c0_13 = arith.constant 0 : index
    %c2 = arith.constant 2 : index
    %c0_14 = arith.constant 0 : index
    %c0_15 = arith.constant 0 : index
    %28 = vector.load %arg1[%c0_13, %c2, %c0_14, %c0_15] : memref<1x3x16x128xf32, #tpu.memory_space<vmem>>, vector<1x1x16x128xf32>
    %29 = vector.shape_cast %28 : vector<1x1x16x128xf32> to vector<16x128xf32>
    %c15_i32_16 = arith.constant 15 : i32
    %30 = tpu.dynamic_rotate %29 by %c15_i32_16 dim 0 : vector<16x128xf32>, i32 -> vector<16x128xf32>
    %31 = arith.subf %30, %29 : vector<16x128xf32>
    %32 = math.absf %31 : vector<16x128xf32>
    %33 = arith.addf %23, %32 : vector<16x128xf32>
    %c127_i32_17 = arith.constant 127 : i32
    %34 = tpu.dynamic_rotate %29 by %c127_i32_17 dim 1 : vector<16x128xf32>, i32 -> vector<16x128xf32>
    %35 = arith.subf %34, %29 : vector<16x128xf32>
    %36 = math.absf %35 : vector<16x128xf32>
    %37 = arith.addf %27, %36 : vector<16x128xf32>
    %cst = arith.constant 2.500000e-01 : f32
    %38 = vector.broadcast %cst : f32 to vector<16x128xf32>
    %39 = arith.mulf %33, %38 : vector<16x128xf32>
    %cst_18 = arith.constant 2.500000e-01 : f32
    %40 = vector.broadcast %cst_18 : f32 to vector<16x128xf32>
    %41 = arith.mulf %37, %40 : vector<16x128xf32>
    %c0_19 = arith.constant 0 : index
    %c0_20 = arith.constant 0 : index
    %42 = vector.load %arg3[%c0_19, %c0_20] : memref<16x128xf32, #tpu.memory_space<vmem>>, vector<16x128xf32>
    %cst_21 = arith.constant 2.400000e-01 : f32
    %43 = vector.broadcast %cst_21 : f32 to vector<16x128xf32>
    %44 = arith.mulf %43, %42 : vector<16x128xf32>
    %45 = arith.mulf %39, %39 : vector<16x128xf32>
    %cst_22 = arith.constant 1111.11121 : f32
    %46 = vector.broadcast %cst_22 : f32 to vector<16x128xf32>
    %47 = arith.mulf %45, %46 : vector<16x128xf32>
    %cst_23 = arith.constant 1.000000e+00 : f32
    %48 = vector.broadcast %cst_23 : f32 to vector<16x128xf32>
    %49 = arith.addf %48, %47 : vector<16x128xf32>
    %50 = arith.divf %44, %49 : vector<16x128xf32>
    %c0_24 = arith.constant 0 : index
    %c0_25 = arith.constant 0 : index
    %c0_26 = arith.constant 0 : index
    %51 = vector.load %arg5[%c0_24, %c0_25, %c0_26] : memref<1x16x128xf32, #tpu.memory_space<vmem>>, vector<1x16x128xf32>
    %52 = vector.shape_cast %51 : vector<1x16x128xf32> to vector<16x128xf32>
    %53 = vector.shape_cast %50 : vector<16x128xf32> to vector<1x16x128xf32>
    tpu.vector_store %arg5[%c0_24, %c0_25, %c0_26], %53 {strides = array<i32>} : memref<1x16x128xf32, #tpu.memory_space<vmem>>, vector<1x16x128xf32>,
    %c0_27 = arith.constant 0 : index
    %c0_28 = arith.constant 0 : index
    %54 = vector.load %arg4[%c0_27, %c0_28] : memref<16x128xf32, #tpu.memory_space<vmem>>, vector<16x128xf32>
    %cst_29 = arith.constant 2.400000e-01 : f32
    %55 = vector.broadcast %cst_29 : f32 to vector<16x128xf32>
    %56 = arith.mulf %55, %54 : vector<16x128xf32>
    %57 = arith.mulf %41, %41 : vector<16x128xf32>
    %cst_30 = arith.constant 1111.11121 : f32
    %58 = vector.broadcast %cst_30 : f32 to vector<16x128xf32>
    %59 = arith.mulf %57, %58 : vector<16x128xf32>
    %cst_31 = arith.constant 1.000000e+00 : f32
    %60 = vector.broadcast %cst_31 : f32 to vector<16x128xf32>
    %61 = arith.addf %60, %59 : vector<16x128xf32>
    %62 = arith.divf %56, %61 : vector<16x128xf32>
    %c0_32 = arith.constant 0 : index
    %c0_33 = arith.constant 0 : index
    %c0_34 = arith.constant 0 : index
    %63 = vector.load %arg6[%c0_32, %c0_33, %c0_34] : memref<1x16x128xf32, #tpu.memory_space<vmem>>, vector<1x16x128xf32>
    %64 = vector.shape_cast %63 : vector<1x16x128xf32> to vector<16x128xf32>
    %65 = vector.shape_cast %62 : vector<16x128xf32> to vector<1x16x128xf32>
    tpu.vector_store %arg6[%c0_32, %c0_33, %c0_34], %65 {strides = array<i32>} : memref<1x16x128xf32, #tpu.memory_space<vmem>>, vector<1x16x128xf32>,
    return
  }
  func.func @transform_0(%arg0: i32) -> (i32, i32, i32, i32) {
    %c0_i32 = arith.constant 0 : i32
    %c0_i32_0 = arith.constant 0 : i32
    %c0_i32_1 = arith.constant 0 : i32
    %c0_i32_2 = arith.constant 0 : i32
    return %arg0, %c0_i32, %c0_i32_0, %c0_i32_1 : i32, i32, i32, i32
  }
  func.func @transform_1(%arg0: i32) -> (i32, i32, i32) {
    %c0_i32 = arith.constant 0 : i32
    %c0_i32_0 = arith.constant 0 : i32
    %c0_i32_1 = arith.constant 0 : i32
    return %arg0, %c0_i32, %c0_i32_0 : i32, i32, i32
  }
  func.func @transform_2(%arg0: i32) -> (i32, i32) {
    %c0_i32 = arith.constant 0 : i32
    %c0_i32_0 = arith.constant 0 : i32
    %c0_i32_1 = arith.constant 0 : i32
    return %c0_i32, %c0_i32_0 : i32, i32
  }
  func.func @transform_3(%arg0: i32) -> (i32, i32) {
    %c0_i32 = arith.constant 0 : i32
    %c0_i32_0 = arith.constant 0 : i32
    %c0_i32_1 = arith.constant 0 : i32
    return %c0_i32, %c0_i32_0 : i32, i32
  }
  func.func @transform_4(%arg0: i32) -> (i32, i32, i32) {
    %c0_i32 = arith.constant 0 : i32
    %c0_i32_0 = arith.constant 0 : i32
    %c0_i32_1 = arith.constant 0 : i32
    return %arg0, %c0_i32, %c0_i32_0 : i32, i32, i32
  }
  func.func @transform_5(%arg0: i32) -> (i32, i32, i32) {
    %c0_i32 = arith.constant 0 : i32
    %c0_i32_0 = arith.constant 0 : i32
    %c0_i32_1 = arith.constant 0 : i32
    return %arg0, %c0_i32, %c0_i32_0 : i32, i32, i32
  }
}

</mosaic_0001>

<bundles_post_ra>
// kernel: tpu_custom_call.1
= control target key start
LH: loop header
LB: loop body
LE: loop exit
PB: predicated region body
PF: predicated region fallthrough
CT: control target
= control target key end

     0   :  { %11 = vsyncpa [#allocation3], 0  ;;  %s602_s0 = inlined_call_operand.hbm [shape: f32[1,3,16,128], index: 0, kind: input, shape index: {}]   ;;  %s603_s1 = inlined_call_operand.hbm [shape: f32[1,16,128], index: 1, kind: input, shape index: {}]   ;;  %s604_s2 = inlined_call_operand.hbm [shape: f32[16,128], index: 2, kind: input, shape index: {}]   ;;  %s605_s3 = inlined_call_operand.hbm [shape: f32[16,128], index: 3, kind: input, shape index: {}]   ;;  %s606_s4 = inlined_call_operand.hbm [shape: f32[1,16,128], index: 4, kind: output, shape index: {0}]   ;;  %s607_s5 = inlined_call_operand.hbm [shape: f32[1,16,128], index: 5, kind: output, shape index: {1}]  }
   0x1   :  { %12 = vsyncpa [#allocation6], 0 }
   0x2   :  { %13 = vsyncpa [#allocation9], 0 }
   0x3   :  { %14 = vsyncpa [#allocation4], 0 }
   0x4   :  { %15 = vsyncpa [#allocation12], 0  ;;  %s395_s18 = smov [#allocation5]   ;;  %s396_s20 = smov [#allocation2]  }
   0x5   :  { %s33_s19 = sshll.u32 %s395_s18, 4  ;;  %s21_s21 = sshll.u32 %s396_s20, 4  ;;  %s34_s19 = int_to_ptr.vmem [resolvable:$true] %s33_s19  ;;  %s434_s21 = int_to_ptr.vmem [resolvable:$true] %s21_s21 }
   0x6   :  { %s253_s24 = scalar_lea.hbm %s603_s1, 256 }
   0x7   :  { %p254_p0 = scmp.ne.s32.totalorder %s603_s1, %s253_s24  ;;  %p257_p1 = scmp.lt.u32.totalorder %s253_s24, %s603_s1 }
   0x9   :  { %p259_p2 = pnand %p257_p1, %p254_p0 }
   0xb   :  { %262 = shalt.err (!%p259_p2)
}
   0xc   :  { %s263_s29 = scalar_lea.vmem %s34_s19, 256  ;;  %p268_p4 = scmp.lt.s32.totalorder %s34_s19, %s34_s19 }
   0xd   :  { %p264_p3 = scmp.ne.s32.totalorder %s34_s19, %s263_s29  ;;  %p269_p5 = scmp.lt.s32.totalorder %s263_s29, %s263_s29 }
   0xf   :  { %p270_p6 = por %p269_p5, %p268_p4 }
  0x11   :  { %p271_p7 = pnand %p270_p6, %p264_p3 }
  0x13   :  { %274 = shalt.err (!%p271_p7)
}
  0x14   :  { %s397_s30 = smov 128   ;;  %s398_s6 = smov 8  }
  0x15   :  { %39 = dma.hbm_to_vmem [thread:$0]  %s603_s1, 256, %s34_s19, [#allocation6], %s397_s30, %s397_s30, %s398_s6  }
  0x16   :  { %s275_s11 = scalar_lea.hbm %s602_s0, 768 }
  0x17   :  { %p276_p8 = scmp.ne.s32.totalorder %s602_s0, %s275_s11  ;;  %p279_p9 = scmp.lt.u32.totalorder %s275_s11, %s602_s0 }
  0x19   :  { %p281_p10 = pnand %p279_p9, %p276_p8 }
  0x1b   :  { %284 = shalt.err (!%p281_p10)
}
  0x1c   :  { %s285_s16 = scalar_lea.vmem %s434_s21, 768  ;;  %p290_p12 = scmp.lt.s32.totalorder %s434_s21, %s434_s21 }
  0x1d   :  { %p286_p11 = scmp.ne.s32.totalorder %s434_s21, %s285_s16  ;;  %p291_p13 = scmp.lt.s32.totalorder %s285_s16, %s285_s16 }
  0x1f   :  { %p292_p0 = por %p291_p13, %p290_p12 }
  0x21   :  { %p293_p1 = pnand %p292_p0, %p286_p11 }
  0x23   :  { %296 = shalt.err (!%p293_p1)
}
  0x24   :  { %27 = dma.hbm_to_vmem [thread:$0]  %s602_s0, 768, %s434_s21, [#allocation3], %s397_s30, %s397_s30, %s398_s6  }
  0x25   :  { %s399_s18 = smov [#allocation7]   ;;  %s400_s20 = smov [#allocation8]  }
  0x26   :  { %s45_s19 = sshll.u32 %s399_s18, 4  ;;  %s57_s22 = sshll.u32 %s400_s20, 4  ;;  %s46_s19 = int_to_ptr.vmem [resolvable:$true] %s45_s19  ;;  %s471_s22 = int_to_ptr.vmem [resolvable:$true] %s57_s22 }
  0x27   :  { %s297_s25 = scalar_lea.hbm %s604_s2, 256 }
  0x28   :  { %p298_p2 = scmp.ne.s32.totalorder %s604_s2, %s297_s25  ;;  %p301_p3 = scmp.lt.u32.totalorder %s297_s25, %s604_s2 }
  0x2a   :  { %p303_p4 = pnand %p301_p3, %p298_p2 }
  0x2c   :  { %306 = shalt.err (!%p303_p4)
}
  0x2d   :  { %s307_s0 = scalar_lea.vmem %s46_s19, 256  ;;  %p312_p6 = scmp.lt.s32.totalorder %s46_s19, %s46_s19 }
  0x2e   :  { %p308_p5 = scmp.ne.s32.totalorder %s46_s19, %s307_s0  ;;  %p313_p7 = scmp.lt.s32.totalorder %s307_s0, %s307_s0 }
  0x30   :  { %p314_p8 = por %p313_p7, %p312_p6 }
  0x32   :  { %p315_p9 = pnand %p314_p8, %p308_p5 }
  0x34   :  { %318 = shalt.err (!%p315_p9)
}
  0x35   :  { %51 = dma.hbm_to_vmem [thread:$0]  %s604_s2, 256, %s46_s19, [#allocation6], %s397_s30, %s397_s30, %s398_s6  }
  0x36   :  { %s319_s10 = scalar_lea.hbm %s605_s3, 256 }
  0x37   :  { %p320_p10 = scmp.ne.s32.totalorder %s605_s3, %s319_s10  ;;  %p323_p11 = scmp.lt.u32.totalorder %s319_s10, %s605_s3 }
  0x39   :  { %p325_p12 = pnand %p323_p11, %p320_p10 }
  0x3b   :  { %328 = shalt.err (!%p325_p12)
}
  0x3c   :  { %s329_s15 = scalar_lea.vmem %s471_s22, 256  ;;  %p334_p0 = scmp.lt.s32.totalorder %s471_s22, %s471_s22 }
  0x3d   :  { %p330_p13 = scmp.ne.s32.totalorder %s471_s22, %s329_s15  ;;  %p335_p1 = scmp.lt.s32.totalorder %s329_s15, %s329_s15 }
  0x3f   :  { %p336_p2 = por %p335_p1, %p334_p0 }
  0x41   :  { %p337_p3 = pnand %p336_p2, %p330_p13 }
  0x43   :  { %340 = shalt.err (!%p337_p3)
}
  0x44   :  { %63 = dma.hbm_to_vmem [thread:$0]  %s605_s3, 256, %s471_s22, [#allocation9], %s397_s30, %s397_s30, %s398_s6  }
  0x45   :  { %385 = dma.done.wait [#allocation3], 768  }
  0x46   :  { %386 = vsyncadd [#allocation3], 4294966528 }
  0x47   :  { %387 = dma.done.wait [#allocation6], 512  }
  0x48   :  { %388 = vsyncadd [#allocation6], 4294966784 }
  0x49   :  { %389 = dma.done.wait [#allocation9], 256  }
  0x4a   :  { %390 = vsyncadd [#allocation9], 4294967040  ;;  %v80_v0 = vlaneseq  ;;  %v508_v2 = vld [vmem:[#allocation2] sm:$0xff]  ;;  %v510_v3 = vld [vmem:[#allocation5] sm:$0xff]  ;;  %s401_s1 = smov 127   ;;  %s402_s3 = smov [#allocation10]  }
  0x4b   :  { %v512_v4 = vld [vmem:[#allocation2 + $0x8] sm:$0xff]  ;;  %109 = vrot.lane.b32.xlu1 %v508_v2, %s401_s1  ;;  %v99_v5 = vrot.slane %v508_v2, 1  ;;  %89 = vrot.lane.b32.xlu0 %v510_v3, %s401_s1  ;;  %v78_v6 = vrot.slane %v510_v3, 1  ;;  %v521_v8 = vld [vmem:[#allocation5 + $0x8] sm:$0xff]  ;;  %v525_v10 = vld [vmem:[#allocation2 + $0x10] sm:$0xff]  ;;  %s206_s17 = sshll.u32 %s402_s3, 4  ;;  %s207_s17 = int_to_ptr.vmem [resolvable:$true] %s206_s17 }
  0x4c   :  { %v81_v1 = vshrl.u32 %v80_v0, 7  ;;  %v100_v7 = vrot.slane %v512_v4, 1  ;;  %v523_v9 = vld [vmem:[#allocation2 + $0x18] sm:$0xff]  ;;  %v79_v11 = vrot.slane %v521_v8, 1  ;;  %v122_v13 = vrot.slane %v525_v10, 1  ;;  %v530_v14 = vld [vmem:[#allocation2 + $0x28] sm:$0xff]  ;;  %p346_p5 = scmp.lt.s32.totalorder %s207_s17, %s207_s17 }
  0x4d   :  { %v123_v12 = vrot.slane %v523_v9, 1  ;;  %v532_v15 = vld [vmem:[#allocation2 + $0x20] sm:$0xff]  ;;  %v146_v18 = vrot.slane %v530_v14, 1  ;;  %v170_v57 = vld [vmem:[#allocation7 + $0x8] sm:$0xff]  ;;  %s341_s18 = scalar_lea.vmem %s207_s17, 256 }
  0x4e   :  { %vm82_vm0 = vcmp.lt.s32.totalorder %v81_v1, 7  ;;  %v145_v19 = vrot.slane %v532_v15, 1  ;;  %v169_v56 = vld [vmem:[#allocation7] sm:$0xff]  ;;  %v172_v59 = vmul.f32 0.24, %v170_v57  ;;  %p342_p4 = scmp.ne.s32.totalorder %s207_s17, %s341_s18  ;;  %p347_p6 = scmp.lt.s32.totalorder %s341_s18, %s341_s18 }
  0x4f   :  { %v101_v16 = vsel %vm82_vm0, %v99_v5, %v100_v7  ;;  %v102_v17 = vsel %vm82_vm0, %v100_v7, %v99_v5  ;;  %v83_v22 = vsel %vm82_vm0, %v78_v6, %v79_v11  ;;  %v84_v23 = vsel %vm82_vm0, %v79_v11, %v78_v6  ;;  %111 = vrot.lane.b32.xlu1 %v512_v4, %s401_s1 }
  0x50   :  { %v103_v20 = vsub.f32 %v101_v16, %v508_v2  ;;  %v104_v21 = vsub.f32 %v102_v17, %v512_v4  ;;  %91 = vrot.lane.b32.xlu0 %v521_v8, %s401_s1  ;;  %v85_v24 = vsub.f32 %v83_v22, %v510_v3  ;;  %v86_v25 = vsub.f32 %v84_v23, %v521_v8  ;;  %p348_p7 = por %p347_p6, %p346_p5 }
  0x51   :  { %v124_v26 = vsel %vm82_vm0, %v122_v13, %v123_v12  ;;  %v125_v29 = vsel %vm82_vm0, %v123_v12, %v122_v13  ;;  %v147_v34 = vsel %vm82_vm0, %v145_v19, %v146_v18  ;;  %v148_v36 = vsel %vm82_vm0, %v146_v18, %v145_v19 }
  0x52   :  { %v105_v27 = vand.u32 2147483647, %v103_v20  ;;  %v106_v28 = vand.u32 2147483647, %v104_v21  ;;  %v126_v30 = vsub.f32 %v124_v26, %v525_v10  ;;  %v87_v31 = vand.u32 2147483647, %v85_v24  ;;  %p349_p8 = pnand %p348_p7, %p342_p4 }
  0x53   :  { %v88_v32 = vand.u32 2147483647, %v86_v25  ;;  %v127_v33 = vsub.f32 %v125_v29, %v523_v9  ;;  %v149_v37 = vsub.f32 %v147_v34, %v532_v15  ;;  %134 = vrot.lane.b32.xlu1 %v523_v9, %s401_s1  ;;  %v150_v41 = vsub.f32 %v148_v36, %v530_v14 }
  0x54   :  { %v128_v35 = vand.u32 2147483647, %v126_v30  ;;  %132 = vrot.lane.b32.xlu0 %v525_v10, %s401_s1  ;;  %v107_v40 = vadd.f32 %v105_v27, %v87_v31  ;;  %v171_v58 = vmul.f32 0.24, %v169_v56 }
  0x55   :  { %v108_v38 = vadd.f32 %v106_v28, %v88_v32  ;;  %v129_v39 = vand.u32 2147483647, %v127_v33  ;;  %v151_v42 = vand.u32 2147483647, %v149_v37  ;;  %v152_v45 = vand.u32 2147483647, %v150_v41 }
  0x56   :  { %v130_v43 = vadd.f32 %v128_v35, %v107_v40 }
  0x57   :  { %v131_v44 = vadd.f32 %v129_v39, %v108_v38  ;;  %157 = vrot.lane.b32.xlu1 %v530_v14, %s401_s1 }
  0x58   :  { %155 = vrot.lane.b32.xlu0 %v532_v15, %s401_s1  ;;  %v153_v46 = vadd.f32 %v151_v42, %v130_v43 }
  0x59   :  { %v154_v47 = vadd.f32 %v152_v45, %v131_v44 }
  0x5a   :  { %v165_v48 = vmul.f32 0.25, %v153_v46 }
  0x5b   :  { %v166_v49 = vmul.f32 0.25, %v154_v47 }
  0x5c   :  { %v173_v50 = vmul.f32 %v165_v48, %v165_v48 }
  0x5d   :  { %v174_v51 = vmul.f32 %v166_v49, %v166_v49 }
  0x5e   :  { %v175_v52 = vmul.f32 1111.1112, %v173_v50 }
  0x5f   :  { %v176_v53 = vmul.f32 1111.1112, %v174_v51 }
  0x60   :  { %v177_v54 = vadd.f32 1.0, %v175_v52 }
  0x61   :  { %v178_v55 = vadd.f32 1.0, %v176_v53 }
  0x62   :  { %245 = vrcp.f32 %v177_v54 }
  0x63   :  { %247 = vrcp.f32 %v178_v55 }
  0x6c   :  { %v246_v60 = vpop.eup %245 }
  0x6d   :  { %v248_v61 = vpop.eup %247  ;;  %v180_v62 = vmul.f32 %v246_v60, %v171_v58 }
  0x6e   :  { %v182_v63 = vmul.f32 %v248_v61, %v172_v59 }
  0x6f   :  { %183 = vst [vmem:[#allocation10] sm:$0xff] %v180_v62 }
  0x70   :  { %184 = vst [vmem:[#allocation10 + $0x8] sm:$0xff] %v182_v63 }
  0x71   :  { %352 = shalt.err (!%p349_p8)
}
  0x72   :  { %s353_s22 = scalar_lea.hbm %s606_s4, 256 }
  0x73   :  { %p354_p9 = scmp.ne.s32.totalorder %s606_s4, %s353_s22  ;;  %p357_p10 = scmp.lt.u32.totalorder %s353_s22, %s606_s4 }
  0x75   :  { %p359_p11 = pnand %p357_p10, %p354_p9 }
  0x77   :  { %362 = shalt.err (!%p359_p11)
}
  0x78   :  { %212 = dma.vmem_to_hbm [thread:$0]  %s207_s17, 256, %s606_s4, [#allocation4], %s397_s30, %s397_s30, %s398_s6   ;;  %v186_v40 = vld [vmem:[#allocation8 + $0x8] sm:$0xff] }
  0x79   :  { %v188_v41 = vmul.f32 0.24, %v186_v40  ;;  %s403_s4 = smov [#allocation11]  }
  0x7a   :  { %s218_s29 = sshll.u32 %s403_s4, 4  ;;  %s219_s29 = int_to_ptr.vmem [resolvable:$true] %s218_s29 }
  0x7b   :  { %s363_s0 = scalar_lea.vmem %s219_s29, 256  ;;  %p368_p13 = scmp.lt.s32.totalorder %s219_s29, %s219_s29 }
  0x7c   :  { %p364_p12 = scmp.ne.s32.totalorder %s219_s29, %s363_s0  ;;  %p369_p0 = scmp.lt.s32.totalorder %s363_s0, %s363_s0 }
  0x7e   :  { %p370_p1 = por %p369_p0, %p368_p13 }
  0x80   :  { %p371_p2 = pnand %p370_p1, %p364_p12 }
  0xbd   :  { %v110_v0 = vpop.permute.xlu1 %109  ;;  %v90_v1 = vpop.permute.xlu0 %89 }
  0xbe   :  { %v113_v5 = vsub.f32 %v110_v0, %v508_v2  ;;  %v93_v6 = vsub.f32 %v90_v1, %v510_v3 }
  0xc0   :  { %v115_v16 = vand.u32 2147483647, %v113_v5  ;;  %v95_v17 = vand.u32 2147483647, %v93_v6 }
  0xc1   :  { %v112_v7 = vpop.permute.xlu1 %111 }
  0xc2   :  { %v92_v11 = vpop.permute.xlu0 %91  ;;  %v114_v12 = vsub.f32 %v112_v7, %v512_v4  ;;  %v117_v26 = vadd.f32 %v115_v16, %v95_v17 }
  0xc3   :  { %v94_v13 = vsub.f32 %v92_v11, %v521_v8 }
  0xc4   :  { %v116_v20 = vand.u32 2147483647, %v114_v12 }
  0xc5   :  { %v135_v18 = vpop.permute.xlu1 %134  ;;  %v96_v21 = vand.u32 2147483647, %v94_v13 }
  0xc6   :  { %v133_v19 = vpop.permute.xlu0 %132  ;;  %v137_v22 = vsub.f32 %v135_v18, %v523_v9 }
  0xc7   :  { %v136_v23 = vsub.f32 %v133_v19, %v525_v10  ;;  %v118_v27 = vadd.f32 %v116_v20, %v96_v21 }
  0xc8   :  { %v139_v24 = vand.u32 2147483647, %v137_v22 }
  0xc9   :  { %v138_v2 = vand.u32 2147483647, %v136_v23  ;;  %v158_v25 = vpop.permute.xlu1 %157 }
  0xca   :  { %v156_v3 = vpop.permute.xlu0 %155  ;;  %v160_v4 = vsub.f32 %v158_v25, %v530_v14  ;;  %v141_v28 = vadd.f32 %v139_v24, %v118_v27  ;;  %v185_v14 = vld [vmem:[#allocation8] sm:$0xff] }
  0xcb   :  { %v159_v8 = vsub.f32 %v156_v3, %v532_v15  ;;  %v140_v29 = vadd.f32 %v138_v2, %v117_v26  ;;  %v187_v15 = vmul.f32 0.24, %v185_v14 }
  0xcc   :  { %v162_v30 = vand.u32 2147483647, %v160_v4 }
  0xcd   :  { %v161_v31 = vand.u32 2147483647, %v159_v8 }
  0xce   :  { %v164_v32 = vadd.f32 %v162_v30, %v141_v28 }
  0xcf   :  { %v163_v33 = vadd.f32 %v161_v31, %v140_v29 }
  0xd0   :  { %v168_v34 = vmul.f32 0.25, %v164_v32 }
  0xd1   :  { %v167_v9 = vmul.f32 0.25, %v163_v33 }
  0xd2   :  { %v190_v35 = vmul.f32 %v168_v34, %v168_v34 }
  0xd3   :  { %v189_v10 = vmul.f32 %v167_v9, %v167_v9 }
  0xd4   :  { %v192_v36 = vmul.f32 1111.1112, %v190_v35 }
  0xd5   :  { %v191_v37 = vmul.f32 1111.1112, %v189_v10 }
  0xd6   :  { %v194_v38 = vadd.f32 1.0, %v192_v36 }
  0xd7   :  { %v193_v39 = vadd.f32 1.0, %v191_v37 }
  0xd8   :  { %249 = vrcp.f32 %v194_v38 }
  0xd9   :  { %251 = vrcp.f32 %v193_v39 }
  0xe2   :  { %v250_v42 = vpop.eup %249 }
  0xe3   :  { %v252_v43 = vpop.eup %251  ;;  %v198_v44 = vmul.f32 %v250_v42, %v188_v41 }
  0xe4   :  { %v196_v45 = vmul.f32 %v252_v43, %v187_v15 }
  0xe5   :  { %200 = vst [vmem:[#allocation11 + $0x8] sm:$0xff] %v198_v44 }
  0xe6   :  { %199 = vst [vmem:[#allocation11] sm:$0xff] %v196_v45 }
  0xe7   :  { %374 = shalt.err (!%p371_p2)
}
  0xe8   :  { %s375_s8 = scalar_lea.hbm %s607_s5, 256 }
  0xe9   :  { %p376_p3 = scmp.ne.s32.totalorder %s607_s5, %s375_s8  ;;  %p379_p4 = scmp.lt.u32.totalorder %s375_s8, %s607_s5 }
  0xeb   :  { %p381_p5 = pnand %p379_p4, %p376_p3 }
  0xed   :  { %384 = shalt.err (!%p381_p5)
}
  0xee   :  { %224 = dma.vmem_to_hbm [thread:$0]  %s219_s29, 256, %s607_s5, [#allocation12], %s397_s30, %s397_s30, %s398_s6  }
  0xef   :  { %391 = dma.done.wait [#allocation4], 256  }
  0xf0   :  { %392 = vsyncadd [#allocation4], 4294967040 }
  0xf1   :  { %393 = dma.done.wait [#allocation12], 256  }
  0xf2   :  { %394 = vsyncadd [#allocation12], 4294967040 }
  0xf3   :  { %231 = vsyncpa [#allocation3], 1 }
  0xf4   :  { %232 = vsyncpa [#allocation6], 1 }
  0xf5   :  { %233 = vsyncpa [#allocation9], 1 }
  0xf6   :  { %234 = vsyncpa [#allocation4], 1 }
  0xf7   :  { %235 = vsyncpa [#allocation12], 1 }

// kernel: tpu_custom_call.1
= control target key start
LH: loop header
LB: loop body
LE: loop exit
PB: predicated region body
PF: predicated region fallthrough
CT: control target
= control target key end

     0   :  { %11 = vsyncpa [#allocation3], 0  ;;  %s602_s0 = inlined_call_operand.hbm [shape: f32[1,3,16,128], index: 0, kind: input, shape index: {}]   ;;  %s603_s1 = inlined_call_operand.hbm [shape: f32[1,16,128], index: 1, kind: input, shape index: {}]   ;;  %s604_s2 = inlined_call_operand.hbm [shape: f32[16,128], index: 2, kind: input, shape index: {}]   ;;  %s605_s3 = inlined_call_operand.hbm [shape: f32[16,128], index: 3, kind: input, shape index: {}]   ;;  %s606_s4 = inlined_call_operand.hbm [shape: f32[1,16,128], index: 4, kind: output, shape index: {0}]   ;;  %s607_s5 = inlined_call_operand.hbm [shape: f32[1,16,128], index: 5, kind: output, shape index: {1}]  }
   0x1   :  { %12 = vsyncpa [#allocation6], 0 }
   0x2   :  { %13 = vsyncpa [#allocation9], 0 }
   0x3   :  { %14 = vsyncpa [#allocation4], 0 }
   0x4   :  { %15 = vsyncpa [#allocation12], 0  ;;  %s395_s18 = smov [#allocation5]   ;;  %s396_s20 = smov [#allocation2]  }
   0x5   :  { %s33_s19 = sshll.u32 %s395_s18, 4  ;;  %s21_s21 = sshll.u32 %s396_s20, 4  ;;  %s34_s19 = int_to_ptr.vmem [resolvable:$true] %s33_s19  ;;  %s434_s21 = int_to_ptr.vmem [resolvable:$true] %s21_s21 }
   0x6   :  { %s253_s24 = scalar_lea.hbm %s603_s1, 256 }
   0x7   :  { %p254_p0 = scmp.ne.s32.totalorder %s603_s1, %s253_s24  ;;  %p257_p1 = scmp.lt.u32.totalorder %s253_s24, %s603_s1 }
   0x9   :  { %p259_p2 = pnand %p257_p1, %p254_p0 }
   0xb   :  { %262 = shalt.err (!%p259_p2)
}
   0xc   :  { %s263_s29 = scalar_lea.vmem %s34_s19, 256  ;;  %p268_p4 = scmp.lt.s32.totalorder %s34_s19, %s34_s19 }
   0xd   :  { %p264_p3 = scmp.ne.s32.totalorder %s34_s19, %s263_s29  ;;  %p269_p5 = scmp.lt.s32.totalorder %s263_s29, %s263_s29 }
   0xf   :  { %p270_p6 = por %p269_p5, %p268_p4 }
  0x11   :  { %p271_p7 = pnand %p270_p6, %p264_p3 }
  0x13   :  { %274 = shalt.err (!%p271_p7)
}
  0x14   :  { %s397_s30 = smov 128   ;;  %s398_s6 = smov 8  }
  0x15   :  { %39 = dma.hbm_to_vmem [thread:$0]  %s603_s1, 256, %s34_s19, [#allocation6], %s397_s30, %s397_s30, %s398_s6  }
  0x16   :  { %s275_s11 = scalar_lea.hbm %s602_s0, 768 }
  0x17   :  { %p276_p8 = scmp.ne.s32.totalorder %s602_s0, %s275_s11  ;;  %p279_p9 = scmp.lt.u32.totalorder %s275_s11, %s602_s0 }
  0x19   :  { %p281_p10 = pnand %p279_p9, %p276_p8 }
  0x1b   :  { %284 = shalt.err (!%p281_p10)
}
  0x1c   :  { %s285_s16 = scalar_lea.vmem %s434_s21, 768  ;;  %p290_p12 = scmp.lt.s32.totalorder %s434_s21, %s434_s21 }
  0x1d   :  { %p286_p11 = scmp.ne.s32.totalorder %s434_s21, %s285_s16  ;;  %p291_p13 = scmp.lt.s32.totalorder %s285_s16, %s285_s16 }
  0x1f   :  { %p292_p0 = por %p291_p13, %p290_p12 }
  0x21   :  { %p293_p1 = pnand %p292_p0, %p286_p11 }
  0x23   :  { %296 = shalt.err (!%p293_p1)
}
  0x24   :  { %27 = dma.hbm_to_vmem [thread:$0]  %s602_s0, 768, %s434_s21, [#allocation3], %s397_s30, %s397_s30, %s398_s6  }
  0x25   :  { %s399_s18 = smov [#allocation7]   ;;  %s400_s20 = smov [#allocation8]  }
  0x26   :  { %s45_s19 = sshll.u32 %s399_s18, 4  ;;  %s57_s22 = sshll.u32 %s400_s20, 4  ;;  %s46_s19 = int_to_ptr.vmem [resolvable:$true] %s45_s19  ;;  %s471_s22 = int_to_ptr.vmem [resolvable:$true] %s57_s22 }
  0x27   :  { %s297_s25 = scalar_lea.hbm %s604_s2, 256 }
  0x28   :  { %p298_p2 = scmp.ne.s32.totalorder %s604_s2, %s297_s25  ;;  %p301_p3 = scmp.lt.u32.totalorder %s297_s25, %s604_s2 }
  0x2a   :  { %p303_p4 = pnand %p301_p3, %p298_p2 }
  0x2c   :  { %306 = shalt.err (!%p303_p4)
}
  0x2d   :  { %s307_s0 = scalar_lea.vmem %s46_s19, 256  ;;  %p312_p6 = scmp.lt.s32.totalorder %s46_s19, %s46_s19 }
  0x2e   :  { %p308_p5 = scmp.ne.s32.totalorder %s46_s19, %s307_s0  ;;  %p313_p7 = scmp.lt.s32.totalorder %s307_s0, %s307_s0 }
  0x30   :  { %p314_p8 = por %p313_p7, %p312_p6 }
  0x32   :  { %p315_p9 = pnand %p314_p8, %p308_p5 }
  0x34   :  { %318 = shalt.err (!%p315_p9)
}
  0x35   :  { %51 = dma.hbm_to_vmem [thread:$0]  %s604_s2, 256, %s46_s19, [#allocation6], %s397_s30, %s397_s30, %s398_s6  }
  0x36   :  { %s319_s10 = scalar_lea.hbm %s605_s3, 256 }
  0x37   :  { %p320_p10 = scmp.ne.s32.totalorder %s605_s3, %s319_s10  ;;  %p323_p11 = scmp.lt.u32.totalorder %s319_s10, %s605_s3 }
  0x39   :  { %p325_p12 = pnand %p323_p11, %p320_p10 }
  0x3b   :  { %328 = shalt.err (!%p325_p12)
}
  0x3c   :  { %s329_s15 = scalar_lea.vmem %s471_s22, 256  ;;  %p334_p0 = scmp.lt.s32.totalorder %s471_s22, %s471_s22 }
  0x3d   :  { %p330_p13 = scmp.ne.s32.totalorder %s471_s22, %s329_s15  ;;  %p335_p1 = scmp.lt.s32.totalorder %s329_s15, %s329_s15 }
  0x3f   :  { %p336_p2 = por %p335_p1, %p334_p0 }
  0x41   :  { %p337_p3 = pnand %p336_p2, %p330_p13 }
  0x43   :  { %340 = shalt.err (!%p337_p3)
}
  0x44   :  { %63 = dma.hbm_to_vmem [thread:$0]  %s605_s3, 256, %s471_s22, [#allocation9], %s397_s30, %s397_s30, %s398_s6  }
  0x45   :  { %385 = dma.done.wait [#allocation3], 768  }
  0x46   :  { %386 = vsyncadd [#allocation3], 4294966528 }
  0x47   :  { %387 = dma.done.wait [#allocation6], 512  }
  0x48   :  { %388 = vsyncadd [#allocation6], 4294966784 }
  0x49   :  { %389 = dma.done.wait [#allocation9], 256  }
  0x4a   :  { %390 = vsyncadd [#allocation9], 4294967040  ;;  %v80_v0 = vlaneseq  ;;  %v508_v2 = vld [vmem:[#allocation2] sm:$0xff]  ;;  %v510_v3 = vld [vmem:[#allocation5] sm:$0xff]  ;;  %s401_s1 = smov 127   ;;  %s402_s3 = smov [#allocation10]  }
  0x4b   :  { %v512_v4 = vld [vmem:[#allocation2 + $0x8] sm:$0xff]  ;;  %109 = vrot.lane.b32.xlu1 %v508_v2, %s401_s1  ;;  %v99_v5 = vrot.slane %v508_v2, 1  ;;  %89 = vrot.lane.b32.xlu0 %v510_v3, %s401_s1  ;;  %v78_v6 = vrot.slane %v510_v3, 1  ;;  %v521_v8 = vld [vmem:[#allocation5 + $0x8] sm:$0xff]  ;;  %v525_v10 = vld [vmem:[#allocation2 + $0x10] sm:$0xff]  ;;  %s206_s17 = sshll.u32 %s402_s3, 4  ;;  %s207_s17 = int_to_ptr.vmem [resolvable:$true] %s206_s17 }
  0x4c   :  { %v81_v1 = vshrl.u32 %v80_v0, 7  ;;  %v100_v7 = vrot.slane %v512_v4, 1  ;;  %v523_v9 = vld [vmem:[#allocation2 + $0x18] sm:$0xff]  ;;  %v79_v11 = vrot.slane %v521_v8, 1  ;;  %v122_v13 = vrot.slane %v525_v10, 1  ;;  %v530_v14 = vld [vmem:[#allocation2 + $0x28] sm:$0xff]  ;;  %p346_p5 = scmp.lt.s32.totalorder %s207_s17, %s207_s17 }
  0x4d   :  { %v123_v12 = vrot.slane %v523_v9, 1  ;;  %v532_v15 = vld [vmem:[#allocation2 + $0x20] sm:$0xff]  ;;  %v146_v18 = vrot.slane %v530_v14, 1  ;;  %v170_v57 = vld [vmem:[#allocation7 + $0x8] sm:$0xff]  ;;  %s341_s18 = scalar_lea.vmem %s207_s17, 256 }
  0x4e   :  { %vm82_vm0 = vcmp.lt.s32.totalorder %v81_v1, 7  ;;  %v145_v19 = vrot.slane %v532_v15, 1  ;;  %v169_v56 = vld [vmem:[#allocation7] sm:$0xff]  ;;  %v172_v59 = vmul.f32 0.24, %v170_v57  ;;  %p342_p4 = scmp.ne.s32.totalorder %s207_s17, %s341_s18  ;;  %p347_p6 = scmp.lt.s32.totalorder %s341_s18, %s341_s18 }
  0x4f   :  { %v101_v16 = vsel %vm82_vm0, %v99_v5, %v100_v7  ;;  %v102_v17 = vsel %vm82_vm0, %v100_v7, %v99_v5  ;;  %v83_v22 = vsel %vm82_vm0, %v78_v6, %v79_v11  ;;  %v84_v23 = vsel %vm82_vm0, %v79_v11, %v78_v6  ;;  %111 = vrot.lane.b32.xlu1 %v512_v4, %s401_s1 }
  0x50   :  { %v103_v20 = vsub.f32 %v101_v16, %v508_v2  ;;  %v104_v21 = vsub.f32 %v102_v17, %v512_v4  ;;  %91 = vrot.lane.b32.xlu0 %v521_v8, %s401_s1  ;;  %v85_v24 = vsub.f32 %v83_v22, %v510_v3  ;;  %v86_v25 = vsub.f32 %v84_v23, %v521_v8  ;;  %p348_p7 = por %p347_p6, %p346_p5 }
  0x51   :  { %v124_v26 = vsel %vm82_vm0, %v122_v13, %v123_v12  ;;  %v125_v29 = vsel %vm82_vm0, %v123_v12, %v122_v13  ;;  %v147_v34 = vsel %vm82_vm0, %v145_v19, %v146_v18  ;;  %v148_v36 = vsel %vm82_vm0, %v146_v18, %v145_v19 }
  0x52   :  { %v105_v27 = vand.u32 2147483647, %v103_v20  ;;  %v106_v28 = vand.u32 2147483647, %v104_v21  ;;  %v126_v30 = vsub.f32 %v124_v26, %v525_v10  ;;  %v87_v31 = vand.u32 2147483647, %v85_v24  ;;  %p349_p8 = pnand %p348_p7, %p342_p4 }
  0x53   :  { %v88_v32 = vand.u32 2147483647, %v86_v25  ;;  %v127_v33 = vsub.f32 %v125_v29, %v523_v9  ;;  %v149_v37 = vsub.f32 %v147_v34, %v532_v15  ;;  %134 = vrot.lane.b32.xlu1 %v523_v9, %s401_s1  ;;  %v150_v41 = vsub.f32 %v148_v36, %v530_v14 }
  0x54   :  { %v128_v35 = vand.u32 2147483647, %v126_v30  ;;  %132 = vrot.lane.b32.xlu0 %v525_v10, %s401_s1  ;;  %v107_v40 = vadd.f32 %v105_v27, %v87_v31  ;;  %v171_v58 = vmul.f32 0.24, %v169_v56 }
  0x55   :  { %v108_v38 = vadd.f32 %v106_v28, %v88_v32  ;;  %v129_v39 = vand.u32 2147483647, %v127_v33  ;;  %v151_v42 = vand.u32 2147483647, %v149_v37  ;;  %v152_v45 = vand.u32 2147483647, %v150_v41 }
  0x56   :  { %v130_v43 = vadd.f32 %v128_v35, %v107_v40 }
  0x57   :  { %v131_v44 = vadd.f32 %v129_v39, %v108_v38  ;;  %157 = vrot.lane.b32.xlu1 %v530_v14, %s401_s1 }
  0x58   :  { %155 = vrot.lane.b32.xlu0 %v532_v15, %s401_s1  ;;  %v153_v46 = vadd.f32 %v151_v42, %v130_v43 }
  0x59   :  { %v154_v47 = vadd.f32 %v152_v45, %v131_v44 }
  0x5a   :  { %v165_v48 = vmul.f32 0.25, %v153_v46 }
  0x5b   :  { %v166_v49 = vmul.f32 0.25, %v154_v47 }
  0x5c   :  { %v173_v50 = vmul.f32 %v165_v48, %v165_v48 }
  0x5d   :  { %v174_v51 = vmul.f32 %v166_v49, %v166_v49 }
  0x5e   :  { %v175_v52 = vmul.f32 1111.1112, %v173_v50 }
  0x5f   :  { %v176_v53 = vmul.f32 1111.1112, %v174_v51 }
  0x60   :  { %v177_v54 = vadd.f32 1.0, %v175_v52 }
  0x61   :  { %v178_v55 = vadd.f32 1.0, %v176_v53 }
  0x62   :  { %245 = vrcp.f32 %v177_v54 }
  0x63   :  { %247 = vrcp.f32 %v178_v55 }
  0x6c   :  { %v246_v60 = vpop.eup %245 }
  0x6d   :  { %v248_v61 = vpop.eup %247  ;;  %v180_v62 = vmul.f32 %v246_v60, %v171_v58 }
  0x6e   :  { %v182_v63 = vmul.f32 %v248_v61, %v172_v59 }
  0x6f   :  { %183 = vst [vmem:[#allocation10] sm:$0xff] %v180_v62 }
  0x70   :  { %184 = vst [vmem:[#allocation10 + $0x8] sm:$0xff] %v182_v63 }
  0x71   :  { %352 = shalt.err (!%p349_p8)
}
  0x72   :  { %s353_s22 = scalar_lea.hbm %s606_s4, 256 }
  0x73   :  { %p354_p9 = scmp.ne.s32.totalorder %s606_s4, %s353_s22  ;;  %p357_p10 = scmp.lt.u32.totalorder %s353_s22, %s606_s4 }
  0x75   :  { %p359_p11 = pnand %p357_p10, %p354_p9 }
  0x77   :  { %362 = shalt.err (!%p359_p11)
}
  0x78   :  { %212 = dma.vmem_to_hbm [thread:$0]  %s207_s17, 256, %s606_s4, [#allocation4], %s397_s30, %s397_s30, %s398_s6   ;;  %v186_v40 = vld [vmem:[#allocation8 + $0x8] sm:$0xff] }
  0x79   :  { %v188_v41 = vmul.f32 0.24, %v186_v40  ;;  %s403_s4 = smov [#allocation11]  }
  0x7a   :  { %s218_s29 = sshll.u32 %s403_s4, 4  ;;  %s219_s29 = int_to_ptr.vmem [resolvable:$true] %s218_s29 }
  0x7b   :  { %s363_s0 = scalar_lea.vmem %s219_s29, 256  ;;  %p368_p13 = scmp.lt.s32.totalorder %s219_s29, %s219_s29 }
  0x7c   :  { %p364_p12 = scmp.ne.s32.totalorder %s219_s29, %s363_s0  ;;  %p369_p0 = scmp.lt.s32.totalorder %s363_s0, %s363_s0 }
  0x7e   :  { %p370_p1 = por %p369_p0, %p368_p13 }
  0x80   :  { %p371_p2 = pnand %p370_p1, %p364_p12 }
  0xbd   :  { %v110_v0 = vpop.permute.xlu1 %109  ;;  %v90_v1 = vpop.permute.xlu0 %89 }
  0xbe   :  { %v113_v5 = vsub.f32 %v110_v0, %v508_v2  ;;  %v93_v6 = vsub.f32 %v90_v1, %v510_v3 }
  0xc0   :  { %v115_v16 = vand.u32 2147483647, %v113_v5  ;;  %v95_v17 = vand.u32 2147483647, %v93_v6 }
  0xc1   :  { %v112_v7 = vpop.permute.xlu1 %111 }
  0xc2   :  { %v92_v11 = vpop.permute.xlu0 %91  ;;  %v114_v12 = vsub.f32 %v112_v7, %v512_v4  ;;  %v117_v26 = vadd.f32 %v115_v16, %v95_v17 }
  0xc3   :  { %v94_v13 = vsub.f32 %v92_v11, %v521_v8 }
  0xc4   :  { %v116_v20 = vand.u32 2147483647, %v114_v12 }
  0xc5   :  { %v135_v18 = vpop.permute.xlu1 %134  ;;  %v96_v21 = vand.u32 2147483647, %v94_v13 }
  0xc6   :  { %v133_v19 = vpop.permute.xlu0 %132  ;;  %v137_v22 = vsub.f32 %v135_v18, %v523_v9 }
  0xc7   :  { %v136_v23 = vsub.f32 %v133_v19, %v525_v10  ;;  %v118_v27 = vadd.f32 %v116_v20, %v96_v21 }
  0xc8   :  { %v139_v24 = vand.u32 2147483647, %v137_v22 }
  0xc9   :  { %v138_v2 = vand.u32 2147483647, %v136_v23  ;;  %v158_v25 = vpop.permute.xlu1 %157 }
  0xca   :  { %v156_v3 = vpop.permute.xlu0 %155  ;;  %v160_v4 = vsub.f32 %v158_v25, %v530_v14  ;;  %v141_v28 = vadd.f32 %v139_v24, %v118_v27  ;;  %v185_v14 = vld [vmem:[#allocation8] sm:$0xff] }
  0xcb   :  { %v159_v8 = vsub.f32 %v156_v3, %v532_v15  ;;  %v140_v29 = vadd.f32 %v138_v2, %v117_v26  ;;  %v187_v15 = vmul.f32 0.24, %v185_v14 }
  0xcc   :  { %v162_v30 = vand.u32 2147483647, %v160_v4 }
  0xcd   :  { %v161_v31 = vand.u32 2147483647, %v159_v8 }
  0xce   :  { %v164_v32 = vadd.f32 %v162_v30, %v141_v28 }
  0xcf   :  { %v163_v33 = vadd.f32 %v161_v31, %v140_v29 }
  0xd0   :  { %v168_v34 = vmul.f32 0.25, %v164_v32 }
  0xd1   :  { %v167_v9 = vmul.f32 0.25, %v163_v33 }
  0xd2   :  { %v190_v35 = vmul.f32 %v168_v34, %v168_v34 }
  0xd3   :  { %v189_v10 = vmul.f32 %v167_v9, %v167_v9 }
  0xd4   :  { %v192_v36 = vmul.f32 1111.1112, %v190_v35 }
  0xd5   :  { %v191_v37 = vmul.f32 1111.1112, %v189_v10 }
  0xd6   :  { %v194_v38 = vadd.f32 1.0, %v192_v36 }
  0xd7   :  { %v193_v39 = vadd.f32 1.0, %v191_v37 }
  0xd8   :  { %249 = vrcp.f32 %v194_v38 }
  0xd9   :  { %251 = vrcp.f32 %v193_v39 }
  0xe2   :  { %v250_v42 = vpop.eup %249 }
  0xe3   :  { %v252_v43 = vpop.eup %251  ;;  %v198_v44 = vmul.f32 %v250_v42, %v188_v41 }
  0xe4   :  { %v196_v45 = vmul.f32 %v252_v43, %v187_v15 }
  0xe5   :  { %200 = vst [vmem:[#allocation11 + $0x8] sm:$0xff] %v198_v44 }
  0xe6   :  { %199 = vst [vmem:[#allocation11] sm:$0xff] %v196_v45 }
  0xe7   :  { %374 = shalt.err (!%p371_p2)
}
  0xe8   :  { %s375_s8 = scalar_lea.hbm %s607_s5, 256 }
  0xe9   :  { %p376_p3 = scmp.ne.s32.totalorder %s607_s5, %s375_s8  ;;  %p379_p4 = scmp.lt.u32.totalorder %s375_s8, %s607_s5 }
  0xeb   :  { %p381_p5 = pnand %p379_p4, %p376_p3 }
  0xed   :  { %384 = shalt.err (!%p381_p5)
}
  0xee   :  { %224 = dma.vmem_to_hbm [thread:$0]  %s219_s29, 256, %s607_s5, [#allocation12], %s397_s30, %s397_s30, %s398_s6  }
  0xef   :  { %391 = dma.done.wait [#allocation4], 256  }
  0xf0   :  { %392 = vsyncadd [#allocation4], 4294967040 }
  0xf1   :  { %393 = dma.done.wait [#allocation12], 256  }
  0xf2   :  { %394 = vsyncadd [#allocation12], 4294967040 }
  0xf3   :  { %231 = vsyncpa [#allocation3], 1 }
  0xf4   :  { %232 = vsyncpa [#allocation6], 1 }
  0xf5   :  { %233 = vsyncpa [#allocation9], 1 }
  0xf6   :  { %234 = vsyncpa [#allocation4], 1 }
  0xf7   :  { %235 = vsyncpa [#allocation12], 1 }

</bundles_post_ra>
